<compile_context>
chip_gen: v6e
topology: v6e:2x2x1
jax: 0.10.0
libtpu: 0.0.40
codegen_flags: <defaults>
</compile_context>

<pallas_src>
import functools
import math

import numpy as np
import jax
import jax.numpy as jnp
from jax import lax
from jax.experimental import pallas as pl
from jax.experimental.pallas import tpu as pltpu

NEG_SLOPE = 0.01  # nn.LeakyReLU(neg_slope=0.01)


def _leaky_relu(x):
    return jnp.where(x >= 0.0, x, NEG_SLOPE * x)


def _softplus(x):
    # Matches torch.nn.Softplus (beta=1, threshold=20).
    return jnp.where(x > 20.0, x, jnp.log1p(jnp.exp(jnp.minimum(x, 20.0))))


def _round_up(n, m):
    return ((n + m - 1) // m) * m


def _layout(S, A, O, H):
    """Static packing layout. Everything here is a Python int -> static slices."""
    W = 2 * H                                  # fused-trunk / slab lane width
    ZP = _round_up(2 * S, 8)                   # padded width of [z_tr | z_po] row
    DIN = max(_round_up(S + A + O, 8), ZP)     # padded width of the data rows
    assert 2 * ZP <= W and 4 * O <= W, "state/obs too large for fused head layout"
    # weight-slab sections: W1, W2, W3, ENC_HEAD, WL1, WL2, WL3, LIK_HEAD
    sec_rows = [DIN, W, W, W, ZP, W, W, W]
    ofs = [0]
    for r in sec_rows:
        ofs.append(ofs[-1] + r)                # all offsets are multiples of 8
    return dict(W=W, ZP=ZP, DIN=DIN, ofs=ofs, rows=ofs[-1])


# ------------------------------- kernel --------------------------------------
def _generative_kernel(S, O, L, data_ref, w_ref, b_ref, out_ref):
    W, ZP, DIN, ofs = L["W"], L["ZP"], L["DIN"], L["ofs"]

    def dot(x, w):
        return jnp.dot(x, w, preferred_element_type=jnp.float32)

    x = data_ref[0:1, 0:DIN]            # [state | action | obs | 0-pad]
    eps = data_ref[1:2, 0:ZP]           # [eps_tr | eps_po | 0-pad]

    # ---- fused transition|posterior trunk (block-diagonal weights) ---------
    h = _leaky_relu(dot(x, w_ref[ofs[0]:ofs[1], :]) + b_ref[0:1, :])
    h = _leaky_relu(dot(h, w_ref[ofs[1]:ofs[2], :]) + b_ref[1:2, :])
    h = _leaky_relu(dot(h, w_ref[ofs[2]:ofs[3], :]) + b_ref[2:3, :])

    # ---- fused mean|var heads for both encoders (single matmul) ------------
    e = dot(h, w_ref[ofs[3]:ofs[4], :]) + b_ref[3:4, :]
    lane = lax.broadcasted_iota(jnp.int32, e.shape, 1)
    # lanes [0, ZP) hold [mu_tr | mu_po], lanes [ZP, 2ZP) hold the raw vars.
    enc = jnp.where(lane < ZP, e, _softplus(e))

    # ---- reparameterize both samples in vregs: z = eps*sqrt(var) + mu ------
    z = eps * jnp.sqrt(enc[:, ZP:2 * ZP]) + enc[:, 0:ZP]          # (1, ZP)

    # ---- fused likelihood decode of both samples (block-diagonal) ----------
    g = _leaky_relu(dot(z, w_ref[ofs[4]:ofs[5], :]) + b_ref[4:5, :])
    g = _leaky_relu(dot(g, w_ref[ofs[5]:ofs[6], :]) + b_ref[5:6, :])
    g = _leaky_relu(dot(g, w_ref[ofs[6]:ofs[7], :]) + b_ref[6:7, :])
    d = dot(g, w_ref[ofs[7]:ofs[8], :]) + b_ref[7:8, :]
    dec = jnp.where(lane < 2 * O, d, _softplus(d))

    # ---- single store: row 0 = encoder outputs, row 1 = decoder outputs ----
    out_ref[...] = jnp.concatenate([enc, dec], axis=0)


# ----------------------- parameter construction ------------------------------
def make_params(key, S, A, O, H):
    """PyTorch nn.Linear-style init; weights stored transposed as (in, out)."""
    def linear(k, din, dout):
        kw, kb = jax.random.split(k)
        bound = 1.0 / math.sqrt(din)
        w = jax.random.uniform(kw, (din, dout), jnp.float32, -bound, bound)
        b = jax.random.uniform(kb, (dout,), jnp.float32, -bound, bound)
        return np.asarray(w), np.asarray(b)

    def mlp(k, din, dout):
        ks = jax.random.split(k, 5)
        return dict(w1=linear(ks[0], din, H), w2=linear(ks[1], H, H),
                    w3=linear(ks[2], H, H), wm=linear(ks[3], H, dout),
                    wv=linear(ks[4], H, dout))

    k_tr, k_po, k_li = jax.random.split(key, 3)
    return dict(transition=mlp(k_tr, S + A, S),
                posterior=mlp(k_po, S + A + O, S),
                likelihood=mlp(k_li, S, O))


def pack_params(raw, S, A, O, H):
    """Pack every Linear into one weight slab + one bias slab (block-diag fusion)."""
    L = _layout(S, A, O, H)
    W, ZP, ofs = L["W"], L["ZP"], L["ofs"]
    w_slab = np.zeros((L["rows"], W), np.float32)
    b_slab = np.zeros((8, W), np.float32)
    t, p, li = raw["transition"], raw["posterior"], raw["likelihood"]

    def blockdiag(a, b):
        out = np.zeros((a.shape[0] + b.shape[0], W), np.float32)
        out[:a.shape[0], 0:a.shape[1]] = a
        out[a.shape[0]:, H:H + b.shape[1]] = b
        return out

    # fused first layer: input row = [state | action | obs | 0-pad]
    W1 = w_slab[ofs[0]:ofs[1]]
    W1[0:S + A, 0:H] = t["w1"][0]               # transition ignores obs rows
    W1[0:S + A + O, H:2 * H] = p["w1"][0]
    b_slab[0, 0:H], b_slab[0, H:2 * H] = t["w1"][1], p["w1"][1]

    # fused trunk layers 2 & 3 (block-diagonal)
    w_slab[ofs[1]:ofs[2]] = blockdiag(t["w2"][0], p["w2"][0])
    b_slab[1, 0:H], b_slab[1, H:2 * H] = t["w2"][1], p["w2"][1]
    w_slab[ofs[2]:ofs[3]] = blockdiag(t["w3"][0], p["w3"][0])
    b_slab[2, 0:H], b_slab[2, H:2 * H] = t["w3"][1], p["w3"][1]

    # fused encoder heads: cols [mu_tr | mu_po | pad | var_tr | var_po | pad]
    EH = w_slab[ofs[3]:ofs[4]]
    EH[0:H, 0:S] = t["wm"][0]
    EH[H:2 * H, S:2 * S] = p["wm"][0]
    EH[0:H, ZP:ZP + S] = t["wv"][0]
    EH[H:2 * H, ZP + S:ZP + 2 * S] = p["wv"][0]
    b_slab[3, 0:S], b_slab[3, S:2 * S] = t["wm"][1], p["wm"][1]
    b_slab[3, ZP:ZP + S], b_slab[3, ZP + S:ZP + 2 * S] = t["wv"][1], p["wv"][1]

    # fused likelihood layer 1: z row = [z_tr | z_po | 0-pad]
    WL1 = w_slab[ofs[4]:ofs[5]]
    WL1[0:S, 0:H] = li["w1"][0]
    WL1[S:2 * S, H:2 * H] = li["w1"][0]
    b_slab[4, 0:H], b_slab[4, H:2 * H] = li["w1"][1], li["w1"][1]

    # fused likelihood trunk layers 2 & 3 (same net on both lane blocks)
    w_slab[ofs[5]:ofs[6]] = blockdiag(li["w2"][0], li["w2"][0])
    b_slab[5, 0:H], b_slab[5, H:2 * H] = li["w2"][1], li["w2"][1]
    w_slab[ofs[6]:ofs[7]] = blockdiag(li["w3"][0], li["w3"][0])
    b_slab[6, 0:H], b_slab[6, H:2 * H] = li["w3"][1], li["w3"][1]

    # fused likelihood heads: cols [dec_mu_tr | dec_mu_po | dec_var_tr | dec_var_po]
    LH = w_slab[ofs[7]:ofs[8]]
    LH[0:H, 0:O] = li["wm"][0]
    LH[H:2 * H, O:2 * O] = li["wm"][0]
    LH[0:H, 2 * O:3 * O] = li["wv"][0]
    LH[H:2 * H, 3 * O:4 * O] = li["wv"][0]
    b_slab[7, 0:O], b_slab[7, O:2 * O] = li["wm"][1], li["wm"][1]
    b_slab[7, 2 * O:3 * O], b_slab[7, 3 * O:4 * O] = li["wv"][1], li["wv"][1]

    return dict(w=jnp.asarray(w_slab), b=jnp.asarray(b_slab))


# ------------------------------- forward --------------------------------------
def generative_model_forward(packed, S, A, O, H, state, action, obs, noise_key):
    """Mirrors GenerativeModel.forward with ONE fused Pallas kernel."""
    L = _layout(S, A, O, H)
    W, ZP, DIN = L["W"], L["ZP"], L["DIN"]

    # Noise for both reparameterizations; packed with the inputs into one slab.
    eps = jax.random.normal(noise_key, (2 * S,), jnp.float32)
    feat = jnp.concatenate([state.astype(jnp.float32),
                            action.astype(jnp.float32),
                            obs.astype(jnp.float32)])
    data = jnp.zeros((2, DIN), jnp.float32)
    data = data.at[0, 0:S + A + O].set(feat)
    data = data.at[1, 0:2 * S].set(eps)

    vspec = pl.BlockSpec(memory_space=pltpu.MemorySpace.VMEM)
    out = pl.pallas_call(
        functools.partial(_generative_kernel, S, O, L),
        out_shape=jax.ShapeDtypeStruct((2, W), jnp.float32),
        in_specs=[vspec, vspec, vspec],
        out_specs=vspec,
    )(data, packed["w"], packed["b"])

    enc, dec = out[0], out[1]
    mu_tr, mu_po = enc[0:S], enc[S:2 * S]
    var_tr, var_po = enc[ZP:ZP + S], enc[ZP + S:ZP + 2 * S]
    dec_mu_tr, dec_mu_po = dec[0:O], dec[O:2 * O]
    dec_var_tr, dec_var_po = dec[2 * O:3 * O], dec[3 * O:4 * O]
    return [(dec_mu_tr, dec_var_tr), (dec_mu_po, dec_var_po),
            mu_tr, var_tr, mu_po, var_po]


# ------------------------- pure-numpy reference -------------------------------
def _reference_forward(raw, state, action, obs, eps):
    def leaky(x):
        return np.where(x >= 0, x, NEG_SLOPE * x)

    def softplus(x):
        return np.where(x > 20, x, np.log1p(np.exp(np.minimum(x, 20))))

    def head(par, x):
        h = x
        for name in ("w1", "w2", "w3"):
            w, b = par[name]
            h = leaky(h @ w + b)
        mu = h @ par["wm"][0] + par["wm"][1]
        var = softplus(h @ par["wv"][0] + par["wv"][1])
        return mu, var

    mu_tr, var_tr = head(raw["transition"], np.concatenate([state, action]))
    mu_po, var_po = head(raw["posterior"], np.concatenate([state, action, obs]))
    S = mu_tr.shape[0]
    z_tr = eps[:S] * np.sqrt(var_tr) + mu_tr
    z_po = eps[S:] * np.sqrt(var_po) + mu_po
    dmu_tr, dvar_tr = head(raw["likelihood"], z_tr)
    dmu_po, dvar_po = head(raw["likelihood"], z_po)
    return (dmu_tr, dvar_tr), (dmu_po, dvar_po), mu_tr, var_tr, mu_po, var_po


if __name__ == "__main__":
    state_size, action_space, observation_space, hidden_size = 4, 2, 4, 32

    root = jax.random.PRNGKey(0)
    k_params, k_state, k_action, k_obs, k_noise = jax.random.split(root, 5)

    raw = make_params(k_params, state_size, action_space, observation_space,
                      hidden_size)
    packed = pack_params(raw, state_size, action_space, observation_space,
                         hidden_size)

    state = jax.random.normal(k_state, (state_size,), jnp.float32)
    action = jax.random.normal(k_action, (action_space,), jnp.float32)
    obs = jax.random.normal(k_obs, (observation_space,), jnp.float32)

    fwd = jax.jit(functools.partial(generative_model_forward, packed,
                                    state_size, action_space,
                                    observation_space, hidden_size))
    out = jax.block_until_ready(fwd(state, action, obs, k_noise))

    (mu_o_tr, var_o_tr), (mu_o_po, var_o_po), mu_tr, var_tr, mu_po, var_po = out
    assert mu_o_tr.shape == (observation_space,)
    assert var_o_po.shape == (observation_space,)
    assert mu_tr.shape == (state_size,) and var_po.shape == (state_size,)
    assert bool(jnp.all(var_tr > 0)) and bool(jnp.all(var_po > 0))
    assert bool(jnp.all(var_o_tr > 0)) and bool(jnp.all(var_o_po > 0))
    assert bool(jnp.all(jnp.isfinite(mu_o_tr))) and bool(jnp.all(jnp.isfinite(mu_o_po)))

    # Validate the fused block-diagonal packing against a plain numpy reference
    # (same noise); tolerance is loose to accommodate MXU accumulation order.
    eps_host = np.asarray(jax.random.normal(k_noise, (2 * state_size,), jnp.float32))
    ref = _reference_forward(raw, np.asarray(state), np.asarray(action),
                             np.asarray(obs), eps_host)
    got = [np.asarray(out[0][0]), np.asarray(out[0][1]),
           np.asarray(out[1][0]), np.asarray(out[1][1]),
           np.asarray(mu_tr), np.asarray(var_tr),
           np.asarray(mu_po), np.asarray(var_po)]
    want = [ref[0][0], ref[0][1], ref[1][0], ref[1][1],
            ref[2], ref[3], ref[4], ref[5]]
    for g, w in zip(got, want):
        np.testing.assert_allclose(g, w, rtol=2e-2, atol=2e-2)

    print("KERNEL_OK")
</pallas_src>

<mosaic_0001>
module attributes {stable_mosaic.version = 11 : i64} {
  func.func @_generative_kernel(%arg0: memref<2x16xf32, #tpu.memory_space<vmem>>, %arg1: memref<408x64xf32, #tpu.memory_space<vmem>>, %arg2: memref<8x64xf32, #tpu.memory_space<vmem>>, %arg3: memref<2x64xf32, #tpu.memory_space<vmem>>) attributes {dimension_semantics = [], scalar_prefetch = 0 : i64, scratch_operands = 0 : i64, tpu.core_type = #tpu.core_type<tc>} {
    %c0 = arith.constant 0 : index
    %c0_0 = arith.constant 0 : index
    %0 = vector.load %arg0[%c0, %c0_0] : memref<2x16xf32, #tpu.memory_space<vmem>>, vector<1x16xf32>
    %c1 = arith.constant 1 : index
    %c0_1 = arith.constant 0 : index
    %1 = vector.load %arg0[%c1, %c0_1] : memref<2x16xf32, #tpu.memory_space<vmem>>, vector<1x8xf32>
    %c0_2 = arith.constant 0 : index
    %c0_3 = arith.constant 0 : index
    %2 = vector.load %arg1[%c0_2, %c0_3] : memref<408x64xf32, #tpu.memory_space<vmem>>, vector<16x64xf32>
    %cst = arith.constant dense<0.000000e+00> : vector<1x64xf32>
    %3 = tpu.matmul %0, %2, %cst {dimension_numbers = #tpu.dot_dimension_numbers<[1], [0], [0], [1], [0, 0, 1, 1], [], []>} : vector<1x16xf32>, vector<16x64xf32>, vector<1x64xf32> -> vector<1x64xf32>
    %c0_4 = arith.constant 0 : index
    %c0_5 = arith.constant 0 : index
    %4 = vector.load %arg2[%c0_4, %c0_5] : memref<8x64xf32, #tpu.memory_space<vmem>>, vector<1x64xf32>
    %5 = arith.addf %3, %4 : vector<1x64xf32>
    %cst_6 = arith.constant 0.000000e+00 : f32
    %6 = vector.broadcast %cst_6 : f32 to vector<1x64xf32>
    %7 = arith.cmpf oge, %5, %6 : vector<1x64xf32>
    %cst_7 = arith.constant 0.00999999977 : f32
    %8 = vector.broadcast %cst_7 : f32 to vector<1x64xf32>
    %9 = arith.mulf %8, %5 : vector<1x64xf32>
    %10 = arith.select %7, %5, %9 : vector<1x64xi1>, vector<1x64xf32>
    %c16 = arith.constant 16 : index
    %c0_8 = arith.constant 0 : index
    %11 = vector.load %arg1[%c16, %c0_8] : memref<408x64xf32, #tpu.memory_space<vmem>>, vector<64x64xf32>
    %cst_9 = arith.constant dense<0.000000e+00> : vector<1x64xf32>
    %12 = tpu.matmul %10, %11, %cst_9 {dimension_numbers = #tpu.dot_dimension_numbers<[1], [0], [0], [1], [0, 0, 1, 1], [], []>} : vector<1x64xf32>, vector<64x64xf32>, vector<1x64xf32> -> vector<1x64xf32>
    %c1_10 = arith.constant 1 : index
    %c0_11 = arith.constant 0 : index
    %13 = vector.load %arg2[%c1_10, %c0_11] : memref<8x64xf32, #tpu.memory_space<vmem>>, vector<1x64xf32>
    %14 = arith.addf %12, %13 : vector<1x64xf32>
    %cst_12 = arith.constant 0.000000e+00 : f32
    %15 = vector.broadcast %cst_12 : f32 to vector<1x64xf32>
    %16 = arith.cmpf oge, %14, %15 : vector<1x64xf32>
    %cst_13 = arith.constant 0.00999999977 : f32
    %17 = vector.broadcast %cst_13 : f32 to vector<1x64xf32>
    %18 = arith.mulf %17, %14 : vector<1x64xf32>
    %19 = arith.select %16, %14, %18 : vector<1x64xi1>, vector<1x64xf32>
    %c80 = arith.constant 80 : index
    %c0_14 = arith.constant 0 : index
    %20 = vector.load %arg1[%c80, %c0_14] : memref<408x64xf32, #tpu.memory_space<vmem>>, vector<64x64xf32>
    %cst_15 = arith.constant dense<0.000000e+00> : vector<1x64xf32>
    %21 = tpu.matmul %19, %20, %cst_15 {dimension_numbers = #tpu.dot_dimension_numbers<[1], [0], [0], [1], [0, 0, 1, 1], [], []>} : vector<1x64xf32>, vector<64x64xf32>, vector<1x64xf32> -> vector<1x64xf32>
    %c2 = arith.constant 2 : index
    %c0_16 = arith.constant 0 : index
    %22 = vector.load %arg2[%c2, %c0_16] : memref<8x64xf32, #tpu.memory_space<vmem>>, vector<1x64xf32>
    %23 = arith.addf %21, %22 : vector<1x64xf32>
    %cst_17 = arith.constant 0.000000e+00 : f32
    %24 = vector.broadcast %cst_17 : f32 to vector<1x64xf32>
    %25 = arith.cmpf oge, %23, %24 : vector<1x64xf32>
    %cst_18 = arith.constant 0.00999999977 : f32
    %26 = vector.broadcast %cst_18 : f32 to vector<1x64xf32>
    %27 = arith.mulf %26, %23 : vector<1x64xf32>
    %28 = arith.select %25, %23, %27 : vector<1x64xi1>, vector<1x64xf32>
    %c144 = arith.constant 144 : index
    %c0_19 = arith.constant 0 : index
    %29 = vector.load %arg1[%c144, %c0_19] : memref<408x64xf32, #tpu.memory_space<vmem>>, vector<64x64xf32>
    %cst_20 = arith.constant dense<0.000000e+00> : vector<1x64xf32>
    %30 = tpu.matmul %28, %29, %cst_20 {dimension_numbers = #tpu.dot_dimension_numbers<[1], [0], [0], [1], [0, 0, 1, 1], [], []>} : vector<1x64xf32>, vector<64x64xf32>, vector<1x64xf32> -> vector<1x64xf32>
    %c3 = arith.constant 3 : index
    %c0_21 = arith.constant 0 : index
    %31 = vector.load %arg2[%c3, %c0_21] : memref<8x64xf32, #tpu.memory_space<vmem>>, vector<1x64xf32>
    %32 = arith.addf %30, %31 : vector<1x64xf32>
    %33 = tpu.iota {dimensions = array<i32: 1>} : vector<1x64xi32>
    %c8_i32 = arith.constant 8 : i32
    %34 = vector.broadcast %c8_i32 : i32 to vector<1x64xi32>
    %35 = arith.cmpi slt, %33, %34 : vector<1x64xi32>
    %cst_22 = arith.constant 2.000000e+01 : f32
    %36 = vector.broadcast %cst_22 : f32 to vector<1x64xf32>
    %37 = arith.cmpf ogt, %32, %36 : vector<1x64xf32>
    %cst_23 = arith.constant 2.000000e+01 : f32
    %38 = vector.broadcast %cst_23 : f32 to vector<1x64xf32>
    %39 = arith.minimumf %32, %38 : vector<1x64xf32>
    %40 = math.exp %39 : vector<1x64xf32>
    %41 = math.log1p %40 : vector<1x64xf32>
    %42 = arith.select %37, %32, %41 : vector<1x64xi1>, vector<1x64xf32>
    %43 = arith.select %35, %32, %42 : vector<1x64xi1>, vector<1x64xf32>
    %44 = vector.extract_strided_slice %43 {offsets = [0, 8], sizes = [1, 8], strides = [1, 1]} : vector<1x64xf32> to vector<1x8xf32>
    %45 = math.sqrt %44 : vector<1x8xf32>
    %46 = arith.mulf %1, %45 : vector<1x8xf32>
    %47 = vector.extract_strided_slice %43 {offsets = [0, 0], sizes = [1, 8], strides = [1, 1]} : vector<1x64xf32> to vector<1x8xf32>
    %48 = arith.addf %46, %47 : vector<1x8xf32>
    %c208 = arith.constant 208 : index
    %c0_24 = arith.constant 0 : index
    %49 = vector.load %arg1[%c208, %c0_24] : memref<408x64xf32, #tpu.memory_space<vmem>>, vector<8x64xf32>
    %cst_25 = arith.constant dense<0.000000e+00> : vector<1x64xf32>
    %50 = tpu.matmul %48, %49, %cst_25 {dimension_numbers = #tpu.dot_dimension_numbers<[1], [0], [0], [1], [0, 0, 1, 1], [], []>} : vector<1x8xf32>, vector<8x64xf32>, vector<1x64xf32> -> vector<1x64xf32>
    %c4 = arith.constant 4 : index
    %c0_26 = arith.constant 0 : index
    %51 = vector.load %arg2[%c4, %c0_26] : memref<8x64xf32, #tpu.memory_space<vmem>>, vector<1x64xf32>
    %52 = arith.addf %50, %51 : vector<1x64xf32>
    %cst_27 = arith.constant 0.000000e+00 : f32
    %53 = vector.broadcast %cst_27 : f32 to vector<1x64xf32>
    %54 = arith.cmpf oge, %52, %53 : vector<1x64xf32>
    %cst_28 = arith.constant 0.00999999977 : f32
    %55 = vector.broadcast %cst_28 : f32 to vector<1x64xf32>
    %56 = arith.mulf %55, %52 : vector<1x64xf32>
    %57 = arith.select %54, %52, %56 : vector<1x64xi1>, vector<1x64xf32>
    %c216 = arith.constant 216 : index
    %c0_29 = arith.constant 0 : index
    %58 = vector.load %arg1[%c216, %c0_29] : memref<408x64xf32, #tpu.memory_space<vmem>>, vector<64x64xf32>
    %cst_30 = arith.constant dense<0.000000e+00> : vector<1x64xf32>
    %59 = tpu.matmul %57, %58, %cst_30 {dimension_numbers = #tpu.dot_dimension_numbers<[1], [0], [0], [1], [0, 0, 1, 1], [], []>} : vector<1x64xf32>, vector<64x64xf32>, vector<1x64xf32> -> vector<1x64xf32>
    %c5 = arith.constant 5 : index
    %c0_31 = arith.constant 0 : index
    %60 = vector.load %arg2[%c5, %c0_31] : memref<8x64xf32, #tpu.memory_space<vmem>>, vector<1x64xf32>
    %61 = arith.addf %59, %60 : vector<1x64xf32>
    %cst_32 = arith.constant 0.000000e+00 : f32
    %62 = vector.broadcast %cst_32 : f32 to vector<1x64xf32>
    %63 = arith.cmpf oge, %61, %62 : vector<1x64xf32>
    %cst_33 = arith.constant 0.00999999977 : f32
    %64 = vector.broadcast %cst_33 : f32 to vector<1x64xf32>
    %65 = arith.mulf %64, %61 : vector<1x64xf32>
    %66 = arith.select %63, %61, %65 : vector<1x64xi1>, vector<1x64xf32>
    %c280 = arith.constant 280 : index
    %c0_34 = arith.constant 0 : index
    %67 = vector.load %arg1[%c280, %c0_34] : memref<408x64xf32, #tpu.memory_space<vmem>>, vector<64x64xf32>
    %cst_35 = arith.constant dense<0.000000e+00> : vector<1x64xf32>
    %68 = tpu.matmul %66, %67, %cst_35 {dimension_numbers = #tpu.dot_dimension_numbers<[1], [0], [0], [1], [0, 0, 1, 1], [], []>} : vector<1x64xf32>, vector<64x64xf32>, vector<1x64xf32> -> vector<1x64xf32>
    %c6 = arith.constant 6 : index
    %c0_36 = arith.constant 0 : index
    %69 = vector.load %arg2[%c6, %c0_36] : memref<8x64xf32, #tpu.memory_space<vmem>>, vector<1x64xf32>
    %70 = arith.addf %68, %69 : vector<1x64xf32>
    %cst_37 = arith.constant 0.000000e+00 : f32
    %71 = vector.broadcast %cst_37 : f32 to vector<1x64xf32>
    %72 = arith.cmpf oge, %70, %71 : vector<1x64xf32>
    %cst_38 = arith.constant 0.00999999977 : f32
    %73 = vector.broadcast %cst_38 : f32 to vector<1x64xf32>
    %74 = arith.mulf %73, %70 : vector<1x64xf32>
    %75 = arith.select %72, %70, %74 : vector<1x64xi1>, vector<1x64xf32>
    %c344 = arith.constant 344 : index
    %c0_39 = arith.constant 0 : index
    %76 = vector.load %arg1[%c344, %c0_39] : memref<408x64xf32, #tpu.memory_space<vmem>>, vector<64x64xf32>
    %cst_40 = arith.constant dense<0.000000e+00> : vector<1x64xf32>
    %77 = tpu.matmul %75, %76, %cst_40 {dimension_numbers = #tpu.dot_dimension_numbers<[1], [0], [0], [1], [0, 0, 1, 1], [], []>} : vector<1x64xf32>, vector<64x64xf32>, vector<1x64xf32> -> vector<1x64xf32>
    %c7 = arith.constant 7 : index
    %c0_41 = arith.constant 0 : index
    %78 = vector.load %arg2[%c7, %c0_41] : memref<8x64xf32, #tpu.memory_space<vmem>>, vector<1x64xf32>
    %79 = arith.addf %77, %78 : vector<1x64xf32>
    %c8_i32_42 = arith.constant 8 : i32
    %80 = vector.broadcast %c8_i32_42 : i32 to vector<1x64xi32>
    %81 = arith.cmpi slt, %33, %80 : vector<1x64xi32>
    %cst_43 = arith.constant 2.000000e+01 : f32
    %82 = vector.broadcast %cst_43 : f32 to vector<1x64xf32>
    %83 = arith.cmpf ogt, %79, %82 : vector<1x64xf32>
    %cst_44 = arith.constant 2.000000e+01 : f32
    %84 = vector.broadcast %cst_44 : f32 to vector<1x64xf32>
    %85 = arith.minimumf %79, %84 : vector<1x64xf32>
    %86 = math.exp %85 : vector<1x64xf32>
    %87 = math.log1p %86 : vector<1x64xf32>
    %88 = arith.select %83, %79, %87 : vector<1x64xi1>, vector<1x64xf32>
    %89 = arith.select %81, %79, %88 : vector<1x64xi1>, vector<1x64xf32>
    %90 = tpu.concatenate %43, %89 in 0 : vector<1x64xf32>, vector<1x64xf32> -> vector<2x64xf32>
    %c0_45 = arith.constant 0 : index
    %c0_46 = arith.constant 0 : index
    %91 = vector.load %arg3[%c0_45, %c0_46] : memref<2x64xf32, #tpu.memory_space<vmem>>, vector<2x64xf32>
    tpu.vector_store %arg3[%c0_45, %c0_46], %90 {strides = array<i32>} : memref<2x64xf32, #tpu.memory_space<vmem>>, vector<2x64xf32>,
    return
  }
}

</mosaic_0001>

<bundles_post_ra>
// kernel: generative_model_forward.1
= control target key start
LH: loop header
LB: loop body
LE: loop exit
PB: predicated region body
PF: predicated region fallthrough
CT: control target
= control target key end

     0   :  { %8 = vsyncpa [#allocation3], 0  ;;  %s983_s12 = smov [#allocation2]   ;;  %s1135_s0 = inlined_call_operand.vmem [shape: f32[2,16], index: 0, kind: input, shape index: {}]   ;;  %s1136_s1 = inlined_call_operand.hbm [shape: f32[408,64], index: 1, kind: input, shape index: {}]   ;;  %s1137_s2 = inlined_call_operand.vmem [shape: f32[8,64], index: 2, kind: input, shape index: {}]   ;;  %s1138_s3 = inlined_call_operand.vmem [shape: f32[2,64], index: 3, kind: output, shape index: {}]  }
   0x1   :  { %s16_s13 = sshll.u32 %s983_s12, 4  ;;  %s17_s13 = int_to_ptr.vmem [resolvable:$true] %s16_s13 }
   0x2   :  { %s969_s14 = scalar_lea.vmem %s17_s13, 6528  ;;  %p974_p1 = scmp.lt.s32.totalorder %s17_s13, %s17_s13 }
   0x3   :  { %p970_p0 = scmp.ne.s32.totalorder %s17_s13, %s969_s14  ;;  %p975_p2 = scmp.lt.s32.totalorder %s969_s14, %s969_s14 }
   0x5   :  { %p976_p3 = por %p975_p2, %p974_p1 }
   0x7   :  { %p977_p4 = pnand %p976_p3, %p970_p0 }
   0x9   :  { %980 = shalt.err (!%p977_p4)
}
   0xa   :  { %s984_s15 = smov 128   ;;  %s985_s16 = smov 8  }
   0xb   :  { %22 = dma.hbm_to_vmem [thread:$0]  %s1136_s1, 6528, %s17_s13, [#allocation3], %s984_s15, %s984_s15, %s985_s16  }
   0xc   :  { %981 = dma.done.wait [#allocation3], 6528  }
   0xd   :  { %982 = vsyncadd [#allocation3], 4294960768  ;;  %v986_v0 = vmov 0.0   ;;  %vm987_vm0 = vmmov 0   ;;  %v31_v1 = vld [vmem:[#allocation2 + $0x8] sm:$0xff]  ;;  %v30_v2 = vld [vmem:[#allocation2] sm:$0xff]  ;;  %v363_v55 = vlaneseq }
   0xe   :  { %819 = vmatprep.subr.mxu1 %v986_v0  ;;  %823 = vmatprep.mubr.msk.f32.mxu1 %vm987_vm0, %v986_v0  ;;  %v28_v3 = vld [vmem:[%s1135_s0] sm:$0x1]  ;;  %vm33_vm1 = vcmask 130048   ;;  %v117_v4 = vld [vmem:[#allocation2 + $0x48] sm:$0xff]  ;;  %v115_v6 = vld [vmem:[#allocation2 + $0x38] sm:$0xff]  ;;  %vm119_vm3 = vcmask 523264  }
   0xf   :  { %845 = vmatprep.subr.mxu0 %v986_v0  ;;  %861 = vmatprep.mubr.msk.f32.mxu0 %vm987_vm0, %v986_v0  ;;  %v116_v5 = vld [vmem:[#allocation2 + $0x40] sm:$0xff]  ;;  %v114_v7 = vld [vmem:[#allocation2 + $0x30] sm:$0xff]  ;;  %v113_v8 = vld [vmem:[#allocation2 + $0x28] sm:$0xff]  ;;  %v1070_v57 = vand.u32 127, %v363_v55  ;;  %s988_s28 = smov 120   ;;  %vm396_vm11 = vcmask 64512  }
  0x10   :  { %820 = vmatpush3.msra.mxu1 %v31_v1  ;;  %v112_v9 = vld [vmem:[#allocation2 + $0x20] sm:$0xff]  ;;  %v111_v10 = vld [vmem:[#allocation2 + $0x18] sm:$0xff]  ;;  %v110_v11 = vld [vmem:[#allocation2 + $0x10] sm:$0xff] }
  0x11   :  { %821 = vmatprep.subr.mxu1 %v986_v0  ;;  %v203_v12 = vld [vmem:[#allocation2 + $0x88] sm:$0xff]  ;;  %v202_v13 = vld [vmem:[#allocation2 + $0x80] sm:$0xff]  ;;  %v201_v14 = vld [vmem:[#allocation2 + $0x78] sm:$0xff]  ;;  %vm365_vm6 = vcmp.lt.s32.totalorder %v1070_v57, 8 }
  0x12   :  { %822 = vmatpush3.msra.mxu1 %v30_v2  ;;  %846 = vmatpush3.msra.mxu0 %v203_v12  ;;  %v200_v15 = vld [vmem:[#allocation2 + $0x70] sm:$0xff]  ;;  %v199_v16 = vld [vmem:[#allocation2 + $0x68] sm:$0xff]  ;;  %v32_v17 = vld [vmem:[%s1137_s2] sm:$0x1] }
  0x13   :  { %824 = vmatmul.mubr.msk.f32.vlgmr.msra.gmra.mxu1 %vm33_vm1, %v28_v3  ;;  %826 = vmatprep.subr.mxu1 %v986_v0  ;;  %v198_v23 = vld [vmem:[#allocation2 + $0x60] sm:$0xff]  ;;  %v197_v24 = vld [vmem:[#allocation2 + $0x58] sm:$0xff]  ;;  %v196_v25 = vld [vmem:[#allocation2 + $0x50] sm:$0xff]  ;;  %vm743_vm1 = vcmask 1040384  }
  0x14   :  { %827 = vmatpush3.msra.mxu1 %v117_v4  ;;  %842 = vmatprep.mubr.msk.f32.mxu1 %vm987_vm0, %v986_v0  ;;  %v288_v26 = vld [vmem:[#allocation2 + $0xc8] sm:$0xff]  ;;  %v287_v27 = vld [vmem:[#allocation2 + $0xc0] sm:$0xff]  ;;  %v286_v28 = vld [vmem:[#allocation2 + $0xb8] sm:$0xff] }
  0x15   :  { %828 = vmatprep.subr.mxu1 %v986_v0  ;;  %847 = vmatprep.subr.mxu0 %v986_v0  ;;  %v285_v29 = vld [vmem:[#allocation2 + $0xb0] sm:$0xff]  ;;  %v284_v30 = vld [vmem:[#allocation2 + $0xa8] sm:$0xff]  ;;  %v118_v31 = vld [vmem:[%s1137_s2 + $0x1] sm:$0x1] }
  0x16   :  { %829 = vmatpush3.msra.mxu1 %v116_v5  ;;  %848 = vmatpush3.msra.mxu0 %v202_v13  ;;  %v283_v37 = vld [vmem:[#allocation2 + $0xa0] sm:$0xff]  ;;  %v282_v38 = vld [vmem:[#allocation2 + $0x98] sm:$0xff]  ;;  %v281_v39 = vld [vmem:[#allocation2 + $0x90] sm:$0xff] }
  0x17   :  { %830 = vmatprep.subr.mxu1 %v986_v0  ;;  %849 = vmatprep.subr.mxu0 %v986_v0  ;;  %v204_v40 = vld [vmem:[%s1137_s2 + $0x2] sm:$0x1]  ;;  %v289_v46 = vld [vmem:[%s1137_s2 + $0x3] sm:$0x1]  ;;  %v394_v2 = vld [vmem:[#allocation2 + $0xd0] sm:$0xff] }
  0x18   :  { %831 = vmatpush3.msra.mxu1 %v115_v6  ;;  %850 = vmatpush3.msra.mxu0 %v201_v14  ;;  %v480_v12 = vld [vmem:[#allocation2 + $0x110] sm:$0xff]  ;;  %v479_v13 = vld [vmem:[#allocation2 + $0x108] sm:$0xff]  ;;  %v478_v14 = vld [vmem:[#allocation2 + $0x100] sm:$0xff] }
  0x19   :  { %832 = vmatprep.subr.mxu1 %v986_v0  ;;  %851 = vmatprep.subr.mxu0 %v986_v0 }
  0x1a   :  { %833 = vmatpush3.msra.mxu1 %v114_v7  ;;  %852 = vmatpush3.msra.mxu0 %v200_v15  ;;  %v477_v15 = vld [vmem:[#allocation2 + $0xf8] sm:$0xff] }
  0x1b   :  { %834 = vmatprep.subr.mxu1 %v986_v0  ;;  %853 = vmatprep.subr.mxu0 %v986_v0 }
  0x1c   :  { %835 = vmatpush3.msra.mxu1 %v113_v8  ;;  %854 = vmatpush3.msra.mxu0 %v199_v16  ;;  %v29_v8 = vld [vmem:[%s1135_s0 + $0x1] sm:$0x1]  ;;  %v476_v16 = vld [vmem:[#allocation2 + $0xf0] sm:$0xff] }
  0x1d   :  { %836 = vmatprep.subr.mxu1 %v986_v0  ;;  %855 = vmatprep.subr.mxu0 %v986_v0 }
  0x1e   :  { %837 = vmatpush3.msra.mxu1 %v112_v9  ;;  %856 = vmatpush3.msra.mxu0 %v198_v23  ;;  %v562_v23 = vld [vmem:[#allocation2 + $0x138] sm:$0xff] }
  0x1f   :  { %838 = vmatprep.subr.mxu1 %v986_v0  ;;  %857 = vmatprep.subr.mxu0 %v986_v0 }
  0x20   :  { %839 = vmatpush3.msra.mxu1 %v111_v10  ;;  %858 = vmatpush3.msra.mxu0 %v197_v24  ;;  %v561_v24 = vld [vmem:[#allocation2 + $0x130] sm:$0xff] }
  0x21   :  { %840 = vmatprep.subr.mxu1 %v986_v0  ;;  %859 = vmatprep.subr.mxu0 %v986_v0 }
  0x22   :  { %841 = vmatpush3.msra.mxu1 %v110_v11  ;;  %860 = vmatpush3.msra.mxu0 %v196_v25  ;;  %v395_v25 = vld [vmem:[%s1137_s2 + $0x4] sm:$0x1] }
  0x23   :  { %864 = vmatprep.subr.mxu1 %v986_v0  ;;  %883 = vmatprep.subr.mxu0 %v986_v0 }
  0xd3   :  { %v103_v18 = vpop.f32.mrf.mxu1 }
  0xd4   :  { %v104_v19 = vadd.f32 %v103_v18, %v32_v17  ;;  %v475_v17 = vld [vmem:[#allocation2 + $0xe8] sm:$0xff]  ;;  %v474_v18 = vld [vmem:[#allocation2 + $0xe0] sm:$0xff] }
  0xd5   :  { %v825_v20 = vpop.f32.mrf.mxu1 }
  0xd6   :  { %vm107_vm2 = vcmp.ge.f32.partialorder %v104_v19, 0.0  ;;  %v108_v21 = vmul.f32 0.01, %v104_v19  ;;  %v565_v20 = vld [vmem:[#allocation2 + $0x150] sm:$0xff] }
  0xd8   :  { %v109_v22 = vsel %vm107_vm2, %v104_v19, %v108_v21  ;;  %v473_v19 = vld [vmem:[#allocation2 + $0xd8] sm:$0xff]  ;;  %v564_v21 = vld [vmem:[#allocation2 + $0x148] sm:$0xff]  ;;  %vm745_vm2 = vcmask 517120  }
  0xd9   :  { %843 = vmatmul.mubr.msk.f32.vlgmr.msra.gmra.mxu1 %vm119_vm3, %v109_v22  ;;  %v563_v22 = vld [vmem:[#allocation2 + $0x140] sm:$0xff] }
  0xda   :  { %880 = vmatprep.mubr.msk.f32.mxu1 %vm987_vm0, %v986_v0  ;;  %865 = vmatpush3.msra.mxu1 %v288_v26 }
  0xdb   :  { %866 = vmatprep.subr.mxu1 %v986_v0 }
  0xdc   :  { %867 = vmatpush3.msra.mxu1 %v287_v27 }
  0xdd   :  { %868 = vmatprep.subr.mxu1 %v986_v0 }
  0xde   :  { %869 = vmatpush3.msra.mxu1 %v286_v28 }
  0xdf   :  { %870 = vmatprep.subr.mxu1 %v986_v0 }
  0xe0   :  { %871 = vmatpush3.msra.mxu1 %v285_v29 }
  0xe1   :  { %872 = vmatprep.subr.mxu1 %v986_v0 }
  0xe2   :  { %873 = vmatpush3.msra.mxu1 %v284_v30 }
  0xe3   :  { %874 = vmatprep.subr.mxu1 %v986_v0 }
  0xe4   :  { %875 = vmatpush3.msra.mxu1 %v283_v37  ;;  %v647_v37 = vld [vmem:[#allocation2 + $0x178] sm:$0xff] }
  0xe5   :  { %876 = vmatprep.subr.mxu1 %v986_v0 }
  0xe6   :  { %877 = vmatpush3.msra.mxu1 %v282_v38  ;;  %v646_v38 = vld [vmem:[#allocation2 + $0x170] sm:$0xff] }
  0xe7   :  { %878 = vmatprep.subr.mxu1 %v986_v0 }
  0xe8   :  { %879 = vmatpush3.msra.mxu1 %v281_v39  ;;  %v481_v39 = vld [vmem:[%s1137_s2 + $0x5] sm:$0x1] }
  0xe9   :  { %907 = vmatprep.subr.mxu1 %v986_v0 }
 0x199   :  { %v189_v32 = vpop.f32.mrf.mxu1 }
 0x19a   :  { %v190_v33 = vadd.f32 %v189_v32, %v118_v31  ;;  %v560_v31 = vld [vmem:[#allocation2 + $0x128] sm:$0xff]  ;;  %v559_v32 = vld [vmem:[#allocation2 + $0x120] sm:$0xff] }
 0x19b   :  { %v844_v34 = vpop.f32.mrf.mxu1 }
 0x19c   :  { %vm193_vm4 = vcmp.ge.f32.partialorder %v190_v33, 0.0  ;;  %v194_v35 = vmul.f32 0.01, %v190_v33  ;;  %v650_v34 = vld [vmem:[#allocation2 + $0x190] sm:$0xff] }
 0x19e   :  { %v195_v36 = vsel %vm193_vm4, %v190_v33, %v194_v35  ;;  %v558_v33 = vld [vmem:[#allocation2 + $0x118] sm:$0xff]  ;;  %v649_v35 = vld [vmem:[#allocation2 + $0x188] sm:$0xff] }
 0x19f   :  { %862 = vmatmul.mubr.msk.f32.vlgmr.msra.gmra.mxu0 %vm119_vm3, %v195_v36  ;;  %v648_v36 = vld [vmem:[#allocation2 + $0x180] sm:$0xff] }
 0x1a0   :  { %885 = vmatprep.mubr.msk.f32.mxu0 %vm987_vm0, %v986_v0  ;;  %884 = vmatpush3.msra.mxu0 %v394_v2 }
 0x1a1   :  { %888 = vmatprep.subr.mxu0 %v986_v0 }
 0x25f   :  { %v274_v41 = vpop.f32.mrf.mxu0 }
 0x260   :  { %v275_v42 = vadd.f32 %v274_v41, %v204_v40 }
 0x261   :  { %v863_v43 = vpop.f32.mrf.mxu0 }
 0x262   :  { %vm278_vm5 = vcmp.ge.f32.partialorder %v275_v42, 0.0  ;;  %v279_v44 = vmul.f32 0.01, %v275_v42 }
 0x264   :  { %v280_v45 = vsel %vm278_vm5, %v275_v42, %v279_v44 }
 0x265   :  { %881 = vmatmul.mubr.msk.f32.vlgmr.msra.gmra.mxu1 %vm119_vm3, %v280_v45  ;;  %v645_v45 = vld [vmem:[#allocation2 + $0x168] sm:$0xff] }
 0x266   :  { %923 = vmatprep.mubr.msk.f32.mxu1 %vm987_vm0, %v986_v0  ;;  %908 = vmatpush3.msra.mxu1 %v565_v20 }
 0x267   :  { %909 = vmatprep.subr.mxu1 %v986_v0 }
 0x268   :  { %910 = vmatpush3.msra.mxu1 %v564_v21 }
 0x269   :  { %911 = vmatprep.subr.mxu1 %v986_v0 }
 0x26a   :  { %912 = vmatpush3.msra.mxu1 %v563_v22 }
 0x26b   :  { %913 = vmatprep.subr.mxu1 %v986_v0 }
 0x26c   :  { %914 = vmatpush3.msra.mxu1 %v562_v23 }
 0x26d   :  { %915 = vmatprep.subr.mxu1 %v986_v0 }
 0x26e   :  { %916 = vmatpush3.msra.mxu1 %v561_v24 }
 0x26f   :  { %917 = vmatprep.subr.mxu1 %v986_v0 }
 0x270   :  { %918 = vmatpush3.msra.mxu1 %v560_v31 }
 0x271   :  { %919 = vmatprep.subr.mxu1 %v986_v0 }
 0x272   :  { %920 = vmatpush3.msra.mxu1 %v559_v32 }
 0x273   :  { %921 = vmatprep.subr.mxu1 %v986_v0 }
 0x274   :  { %922 = vmatpush3.msra.mxu1 %v558_v33 }
 0x325   :  { %v359_v47 = vpop.f32.mrf.mxu1 }
 0x326   :  { %v360_v48 = vadd.f32 %v359_v47, %v289_v46  ;;  %v644_v46 = vld [vmem:[#allocation2 + $0x160] sm:$0xff]  ;;  %v643_v47 = vld [vmem:[#allocation2 + $0x158] sm:$0xff] }
 0x327   :  { %v882_v49 = vpop.f32.mrf.mxu1 }
 0x328   :  { %v367_v50 = vmin.f32 %v360_v48, 20.0  ;;  %vm366_vm8 = vcmp.gt.f32.partialorder %v360_v48, 20.0 }
 0x32a   :  { %v368_v51 = vmul.f32 1.442695, %v367_v50 }
 0x32c   :  { %951 = vpow2.f32 %v368_v51 }
 0x339   :  { %v952_v52 = vpop.eup %951 }
 0x33a   :  { %v370_v53 = vadd.f32 1.0, %v952_v52  ;;  %v373_v54 = vmul.f32 -0.5, %v952_v52  ;;  %v376_v58 = vand.u32 2147483647, %v952_v52 }
 0x33c   :  { %953 = vlog2.f32 %v370_v53  ;;  %v374_v56 = vadd.f32 1.0, %v373_v54  ;;  %vm377_vm7 = vcmp.lt.f32.partialorder %v376_v58, 0.0004427343  ;;  %v651_v54 = vld [vmem:[%s1137_s2 + $0x7] sm:$0x1] }
 0x33e   :  { %v375_v61 = vmul.f32 %v952_v52, %v374_v56 }
 0x349   :  { %v954_v59 = vpop.eup %953 }
 0x34a   :  { %v372_v60 = vmul.f32 0.6931472, %v954_v59 }
 0x34c   :  { %v378_v62 = vsel %vm377_vm7, %v375_v61, %v372_v60 }
 0x34d   :  { %v379_v63 = vsel %vm366_vm8, %v360_v48, %v378_v62 }
 0x34e   :  { %v1075_v1 = vsel %vm365_vm6, %v360_v48, %v379_v63  ;;  %v566_v48 = vld [vmem:[%s1137_s2 + $0x6] sm:$0x1] }
 0x34f   :  { %955 = vrsqrt.f32 %v1075_v1  ;;  %vm383_vm9 = vcmp.eq.f32.partialorder %v1075_v1, inf  ;;  %v386_v5 = vand.u32 2147483648, %v1075_v1  ;;  %vm385_vm10 = vcmp.eq.f32.partialorder %v1075_v1, 0.0 }
 0x35c   :  { %v956_v3 = vpop.eup %955 }
 0x35d   :  { %v382_v4 = vmul.f32 %v956_v3, %v1075_v1 }
 0x35f   :  { %v384_v6 = vsel %vm383_vm9, %v1075_v1, %v382_v4 }
 0x360   :  { %v387_v7 = vsel %vm385_vm10, %v386_v5, %v384_v6 }
 0x361   :  { %389 = vrot.lane.b32.xlu0 %v387_v7, %s988_s28 }
 0x3d3   :  { %v390_v9 = vpop.permute.xlu0 %389 }
 0x3d4   :  { %v392_v10 = vmul.f32 %v390_v9, %v29_v8 }
 0x3d6   :  { %v393_v11 = vadd.f32 %v392_v10, %v1075_v1 }
 0x3d8   :  { %886 = vmatmul.mubr.msk.f32.vlgmr.msra.gmra.mxu0 %vm396_vm11, %v393_v11 }
 0x3d9   :  { %889 = vmatpush3.msra.mxu0 %v480_v12  ;;  %904 = vmatprep.mubr.msk.f32.mxu0 %vm987_vm0, %v986_v0 }
 0x3da   :  { %890 = vmatprep.subr.mxu0 %v986_v0 }
 0x3db   :  { %891 = vmatpush3.msra.mxu0 %v479_v13 }
 0x3dc   :  { %892 = vmatprep.subr.mxu0 %v986_v0 }
 0x3dd   :  { %893 = vmatpush3.msra.mxu0 %v478_v14 }
 0x3de   :  { %894 = vmatprep.subr.mxu0 %v986_v0 }
 0x3df   :  { %895 = vmatpush3.msra.mxu0 %v477_v15 }
 0x3e0   :  { %896 = vmatprep.subr.mxu0 %v986_v0 }
 0x3e1   :  { %897 = vmatpush3.msra.mxu0 %v476_v16 }
 0x3e2   :  { %898 = vmatprep.subr.mxu0 %v986_v0 }
 0x3e3   :  { %899 = vmatpush3.msra.mxu0 %v475_v17 }
 0x3e4   :  { %900 = vmatprep.subr.mxu0 %v986_v0 }
 0x3e5   :  { %901 = vmatpush3.msra.mxu0 %v474_v18 }
 0x3e6   :  { %902 = vmatprep.subr.mxu0 %v986_v0 }
 0x3e7   :  { %903 = vmatpush3.msra.mxu0 %v473_v19 }
 0x3e8   :  { %926 = vmatprep.subr.mxu0 %v986_v0 }
 0x498   :  { %v466_v26 = vpop.f32.mrf.mxu0 }
 0x499   :  { %v467_v27 = vadd.f32 %v466_v26, %v395_v25 }
 0x49a   :  { %v887_v28 = vpop.f32.mrf.mxu0 }
 0x49b   :  { %vm470_vm12 = vcmp.ge.f32.partialorder %v467_v27, 0.0  ;;  %v471_v29 = vmul.f32 0.01, %v467_v27 }
 0x49d   :  { %v472_v30 = vsel %vm470_vm12, %v467_v27, %v471_v29 }
 0x49e   :  { %905 = vmatmul.mubr.msk.f32.vlgmr.msra.gmra.mxu0 %vm119_vm3, %v472_v30 }
 0x49f   :  { %942 = vmatprep.mubr.msk.f32.mxu0 %vm987_vm0, %v986_v0  ;;  %927 = vmatpush3.msra.mxu0 %v650_v34 }
 0x4a0   :  { %928 = vmatprep.subr.mxu0 %v986_v0 }
 0x4a1   :  { %929 = vmatpush3.msra.mxu0 %v649_v35 }
 0x4a2   :  { %930 = vmatprep.subr.mxu0 %v986_v0 }
 0x4a3   :  { %931 = vmatpush3.msra.mxu0 %v648_v36 }
 0x4a4   :  { %932 = vmatprep.subr.mxu0 %v986_v0 }
 0x4a5   :  { %933 = vmatpush3.msra.mxu0 %v647_v37 }
 0x4a6   :  { %934 = vmatprep.subr.mxu0 %v986_v0 }
 0x4a7   :  { %935 = vmatpush3.msra.mxu0 %v646_v38 }
 0x4a8   :  { %936 = vmatprep.subr.mxu0 %v986_v0 }
 0x4a9   :  { %937 = vmatpush3.msra.mxu0 %v645_v45 }
 0x4aa   :  { %938 = vmatprep.subr.mxu0 %v986_v0 }
 0x4ab   :  { %939 = vmatpush3.msra.mxu0 %v644_v46 }
 0x4ac   :  { %940 = vmatprep.subr.mxu0 %v986_v0 }
 0x4ad   :  { %941 = vmatpush3.msra.mxu0 %v643_v47 }
 0x55e   :  { %v551_v40 = vpop.f32.mrf.mxu0 }
 0x55f   :  { %v552_v41 = vadd.f32 %v551_v40, %v481_v39 }
 0x560   :  { %v906_v42 = vpop.f32.mrf.mxu0 }
 0x561   :  { %vm555_vm13 = vcmp.ge.f32.partialorder %v552_v41, 0.0  ;;  %v556_v43 = vmul.f32 0.01, %v552_v41 }
 0x563   :  { %v557_v44 = vsel %vm555_vm13, %v552_v41, %v556_v43 }
 0x564   :  { %924 = vmatmul.mubr.msk.f32.vlgmr.msra.gmra.mxu1 %vm119_vm3, %v557_v44 }
 0x624   :  { %v636_v49 = vpop.f32.mrf.mxu1 }
 0x625   :  { %v637_v50 = vadd.f32 %v636_v49, %v566_v48 }
 0x626   :  { %v925_v51 = vpop.f32.mrf.mxu1 }
 0x627   :  { %vm640_vm14 = vcmp.ge.f32.partialorder %v637_v50, 0.0  ;;  %v641_v52 = vmul.f32 0.01, %v637_v50 }
 0x629   :  { %v642_v53 = vsel %vm640_vm14, %v637_v50, %v641_v52 }
 0x62a   :  { %943 = vmatmul.mubr.msk.f32.vlgmr.msra.gmra.mxu0 %vm119_vm3, %v642_v53 }
 0x6ea   :  { %v721_v55 = vpop.f32.mrf.mxu0 }
 0x6eb   :  { %v722_v0 = vadd.f32 %v721_v55, %v651_v54 }
 0x6ec   :  { %v944_v56 = vpop.f32.mrf.mxu0 }
 0x6ed   :  { %v726_v58 = vmin.f32 %v722_v0, 20.0  ;;  %vm725_vm0 = vcmp.gt.f32.partialorder %v722_v0, 20.0 }
 0x6ef   :  { %v727_v59 = vmul.f32 1.442695, %v726_v58 }
 0x6f1   :  { %957 = vpow2.f32 %v727_v59 }
 0x6fe   :  { %v958_v60 = vpop.eup %957 }
 0x6ff   :  { %v729_v61 = vadd.f32 1.0, %v958_v60  ;;  %v732_v62 = vmul.f32 -0.5, %v958_v60  ;;  %v735_v2 = vand.u32 2147483647, %v958_v60 }
 0x701   :  { %959 = vlog2.f32 %v729_v61  ;;  %v733_v63 = vadd.f32 1.0, %v732_v62  ;;  %vm736_vm15 = vcmp.lt.f32.partialorder %v735_v2, 0.0004427343 }
 0x703   :  { %v734_v5 = vmul.f32 %v958_v60, %v733_v63 }
 0x70e   :  { %v960_v3 = vpop.eup %959 }
 0x70f   :  { %v731_v4 = vmul.f32 0.6931472, %v960_v3 }
 0x711   :  { %v737_v6 = vsel %vm736_vm15, %v734_v5, %v731_v4 }
 0x712   :  { %v738_v7 = vsel %vm725_vm0, %v722_v0, %v737_v6 }
 0x713   :  { %v739_v8 = vsel %vm365_vm6, %v722_v0, %v738_v7 }
 0x714   :  { %v741_v9 = vrot.slane %v739_v8, 7 }
 0x716   :  { %v744_v10 = vsel %vm743_vm1, %v1075_v1, %v741_v9 }
 0x717   :  { %746 = vst.msk [vmem:[%s1138_s3] sm:$0x3] %vm745_vm2, %v744_v10 }
 0x718   :  { %751 = vsyncpa [#allocation3], 1 }

</bundles_post_ra>
